<compile_context>
chip_gen: v7x
topology: tpu7x:2x2x1
jax: 0.10.0
libtpu: 0.0.40
codegen_flags: <defaults>
</compile_context>

<pallas_src>
import functools

import jax
import jax.numpy as jnp
from jax.experimental import pallas as pl
from jax.experimental.pallas import tpu as pltpu


# ----------------------------------------------------------------------------
# Kernels
# ----------------------------------------------------------------------------
def _mm_bias_kernel_f32(inp_ref, x1_ref, bias_ref, out_ref):
    """f32 output: accumulate directly into the resident output tile."""
    k = pl.program_id(2)

    @pl.when(k == 0)
    def _():
        out_ref[...] = bias_ref[...]

    out_ref[...] += jnp.dot(
        inp_ref[...], x1_ref[...], preferred_element_type=jnp.float32
    )


def _mm_bias_kernel_acc(inp_ref, x1_ref, bias_ref, out_ref, acc_ref):
    """Low-precision output: f32 scratch accumulator, single downcast at end."""
    k = pl.program_id(2)

    @pl.when(k == 0)
    def _():
        acc_ref[...] = bias_ref[...].astype(jnp.float32)

    acc_ref[...] += jnp.dot(
        inp_ref[...], x1_ref[...], preferred_element_type=jnp.float32
    )

    @pl.when(k == pl.num_programs(2) - 1)
    def _():
        out_ref[...] = acc_ref[...].astype(out_ref.dtype)


# ----------------------------------------------------------------------------
# Tiling helpers
# ----------------------------------------------------------------------------
def _round_up(x, m):
    return (x + m - 1) // m * m


def _pick_tile(dim, target, quantum=128):
    """Return (tile, padded_dim) with tile | padded_dim.

    Preference order:
      1. full-extent block (dim <= target)             -> no alignment rule
      2. largest quantum-aligned divisor of dim        -> no padding needed
      3. quantum-aligned tile minimizing padding       -> minimal jnp.pad
    """
    if dim <= target:
        return dim, dim
    base = max(quantum, (target // quantum) * quantum)
    t = base
    while t >= quantum:
        if dim % t == 0:
            return t, dim
        t -= quantum
    best_t, best_pad = quantum, _round_up(dim, quantum) - dim
    t = 2 * quantum
    while t <= base:
        pad = _round_up(dim, t) - dim
        if pad <= best_pad:  # tie -> prefer larger tile
            best_t, best_pad = t, pad
        t += quantum
    return best_t, dim + best_pad


@functools.lru_cache(maxsize=None)
def _vmem_limit_bytes():
    try:
        cap = int(pltpu.get_tpu_info().vmem_capacity_bytes)
    except Exception:
        cap = 64 * 1024 * 1024  # conservative (safe even on v7x's 64 MiB)
    # 96 MiB on v5e/v6e (128 MiB physical), 48 MiB on v7x (64 MiB physical)
    return min(96 * 1024 * 1024, int(0.75 * cap))


# ----------------------------------------------------------------------------
# Wrapper
# ----------------------------------------------------------------------------
def mm_add(inp, x1, bias, *, tm=512, tn=512, tk=1024, force_pallas=False):
    M, K = inp.shape
    K2, N = x1.shape
    assert K == K2, "inner dims must match"
    out_dtype = inp.dtype
    bias = jnp.broadcast_to(bias, (M, N)).astype(out_dtype)

    # Small-shape fast path: kernel launch + DMA setup would dominate.
    if not force_pallas and M * N * K <= (1 << 21):
        return jnp.dot(inp, x1) + bias

    tm_e, Mp = _pick_tile(M, tm)
    tn_e, Np = _pick_tile(N, tn)
    tk_e, Kp = _pick_tile(K, tk)
    gm, gn, gk = Mp // tm_e, Np // tn_e, Kp // tk_e

    # v7x megacore balance: avoid a single-tile parallel grid when M splits
    # cleanly into two sublane-aligned halves.
    if gm * gn == 1 and Mp >= 16 and Mp % 16 == 0:
        tm_e = Mp // 2
        gm = 2

    # Minimal-padding fallback (only dims for which no aligned divisor exists).
    if Mp != M or Kp != K:
        inp = jnp.pad(inp, ((0, Mp - M), (0, Kp - K)))
    if Kp != K or Np != N:
        x1 = jnp.pad(x1, ((0, Kp - K), (0, Np - N)))
    if Mp != M or Np != N:
        bias = jnp.pad(bias, ((0, Mp - M), (0, Np - N)))

    if out_dtype == jnp.float32:
        kernel = _mm_bias_kernel_f32
        scratch = []
    else:
        kernel = _mm_bias_kernel_acc
        scratch = [pltpu.VMEM((tm_e, tn_e), jnp.float32)]

    itemsize = jnp.dtype(out_dtype).itemsize
    out = pl.pallas_call(
        kernel,
        out_shape=jax.ShapeDtypeStruct((Mp, Np), out_dtype),
        grid_spec=pltpu.PrefetchScalarGridSpec(
            num_scalar_prefetch=0,
            grid=(gm, gn, gk),
            in_specs=[
                pl.BlockSpec((tm_e, tk_e), lambda i, j, k: (i, k)),
                pl.BlockSpec((tk_e, tn_e), lambda i, j, k: (k, j)),
                # Bias tile tracks the output tile (k-invariant -> fetched once
                # per output tile, stays resident across the reduction).
                pl.BlockSpec((tm_e, tn_e), lambda i, j, k: (i, j)),
            ],
            out_specs=pl.BlockSpec((tm_e, tn_e), lambda i, j, k: (i, j)),
            scratch_shapes=scratch,
        ),
        compiler_params=pltpu.CompilerParams(
            dimension_semantics=("parallel", "parallel", "arbitrary"),
            vmem_limit_bytes=_vmem_limit_bytes(),
        ),
        cost_estimate=pl.CostEstimate(
            flops=2 * Mp * Np * Kp + Mp * Np,
            transcendentals=0,
            # Count panel re-reads across the non-reduced grid axes.
            bytes_accessed=itemsize
            * (Mp * Kp * gn + Kp * Np * gm + 2 * Mp * Np),
        ),
    )(inp, x1, bias)

    if (Mp, Np) != (M, N):
        out = out[:M, :N]
    return out


def model_forward(x1, x2, inp, bias):
    # x2 is accepted but unused, mirroring the PyTorch module's signature.
    del x2
    return mm_add(inp, x1, bias)


# ----------------------------------------------------------------------------
# Self-test
# ----------------------------------------------------------------------------
if __name__ == "__main__":
    key = jax.random.PRNGKey(0)
    k1, k2, k3, k4, k5, k6, k7, k8, k9, k10 = jax.random.split(key, 10)

    # 1) Module-faithful shapes: all (3, 3) float32.
    x1 = jax.random.normal(k1, (3, 3), dtype=jnp.float32)
    x2 = jax.random.normal(k2, (3, 3), dtype=jnp.float32)  # unused by forward
    inp = jax.random.normal(k3, (3, 3), dtype=jnp.float32)
    bias = jax.random.normal(k4, (3, 3), dtype=jnp.float32)
    ref = jnp.dot(inp, x1) + bias

    # 1a) Default entry point (small-shape fast path, no kernel launch).
    out = jax.block_until_ready(model_forward(x1, x2, inp, bias))
    assert out.shape == (3, 3)
    assert jnp.allclose(out, ref, atol=1e-5, rtol=1e-5)

    # 1b) Force the Pallas kernel on the module-faithful shapes
    #     (single full-extent block, grid (1,1,1)).
    out_k = jax.block_until_ready(mm_add(inp, x1, bias, force_pallas=True))
    assert jnp.allclose(out_k, ref, atol=1e-5, rtol=1e-5)

    # 2) Multi-tile path: divisor tiles -> no padding, grid (2,2,2),
    #    direct accumulation into the resident output tile.
    M, K, N = 1024, 1536, 1024
    a = jax.random.normal(k5, (M, K), dtype=jnp.float32)
    b = jax.random.normal(k6, (K, N), dtype=jnp.float32)
    c = jax.random.normal(k7, (M, N), dtype=jnp.float32)
    out2 = jax.block_until_ready(mm_add(a, b, c))
    ref2 = jnp.dot(a, b) + c
    assert out2.shape == (M, N)
    assert jnp.allclose(out2, ref2, atol=1e-2, rtol=1e-2)

    # 3) Ragged-K fallback (K=1100 has no 128-aligned divisor <= 1024): minimal
    #    zero-padding of the reduction dim only, M split for megacore balance.
    M3, K3, N3 = 256, 1100, 256
    a3 = jax.random.normal(k8, (M3, K3), dtype=jnp.float32)
    b3 = jax.random.normal(k9, (K3, N3), dtype=jnp.float32)
    c3 = jax.random.normal(k10, (M3, N3), dtype=jnp.float32)
    out3 = jax.block_until_ready(mm_add(a3, b3, c3, force_pallas=True))
    ref3 = jnp.dot(a3, b3) + c3
    assert out3.shape == (M3, N3)
    assert jnp.allclose(out3, ref3, atol=1e-2, rtol=1e-2)

    print("KERNEL_OK")
</pallas_src>

<mosaic_0001>
module attributes {stable_mosaic.version = 11 : i64} {
  func.func @_mm_bias_kernel_f32(%arg0: i32, %arg1: i32, %arg2: i32, %arg3: memref<3x3xf32, #tpu.memory_space<vmem>>, %arg4: memref<3x3xf32, #tpu.memory_space<vmem>>, %arg5: memref<3x3xf32, #tpu.memory_space<vmem>>, %arg6: memref<3x3xf32, #tpu.memory_space<vmem>>) attributes {dimension_semantics = [#tpu.dimension_semantics<parallel>, #tpu.dimension_semantics<parallel>, #tpu.dimension_semantics<arbitrary>], iteration_bounds = array<i64: 1, 1, 1>, scalar_prefetch = 0 : i64, scratch_operands = 0 : i64, tpu.core_type = #tpu.core_type<tc>, window_params = [{transform_indices = @transform_0, window_bounds = array<i64: 3, 3>}, {transform_indices = @transform_1, window_bounds = array<i64: 3, 3>}, {transform_indices = @transform_2, window_bounds = array<i64: 3, 3>}, {transform_indices = @transform_3, window_bounds = array<i64: 3, 3>}]} {
    %c0_i32 = arith.constant 0 : i32
    %0 = arith.cmpi eq, %arg2, %c0_i32 : i32
    %1 = arith.extui %0 : i1 to i32
    %c0_i32_0 = arith.constant 0 : i32
    %2 = arith.cmpi ne, %1, %c0_i32_0 : i32
    scf.if %2 {
      %c0_8 = arith.constant 0 : index
      %c0_9 = arith.constant 0 : index
      %9 = vector.load %arg5[%c0_8, %c0_9] : memref<3x3xf32, #tpu.memory_space<vmem>>, vector<3x3xf32>
      %c0_10 = arith.constant 0 : index
      %c0_11 = arith.constant 0 : index
      %10 = vector.load %arg6[%c0_10, %c0_11] : memref<3x3xf32, #tpu.memory_space<vmem>>, vector<3x3xf32>
      tpu.vector_store %arg6[%c0_10, %c0_11], %9 {strides = array<i32>} : memref<3x3xf32, #tpu.memory_space<vmem>>, vector<3x3xf32>,
    } else {
    }
    %c0 = arith.constant 0 : index
    %c0_1 = arith.constant 0 : index
    %3 = vector.load %arg6[%c0, %c0_1] : memref<3x3xf32, #tpu.memory_space<vmem>>, vector<3x3xf32>
    %c0_2 = arith.constant 0 : index
    %c0_3 = arith.constant 0 : index
    %4 = vector.load %arg3[%c0_2, %c0_3] : memref<3x3xf32, #tpu.memory_space<vmem>>, vector<3x3xf32>
    %c0_4 = arith.constant 0 : index
    %c0_5 = arith.constant 0 : index
    %5 = vector.load %arg4[%c0_4, %c0_5] : memref<3x3xf32, #tpu.memory_space<vmem>>, vector<3x3xf32>
    %cst = arith.constant dense<0.000000e+00> : vector<3x3xf32>
    %6 = tpu.matmul %4, %5, %cst {dimension_numbers = #tpu.dot_dimension_numbers<[1], [0], [0], [1], [0, 0, 1, 1], [], []>} : vector<3x3xf32>, vector<3x3xf32>, vector<3x3xf32> -> vector<3x3xf32>
    %7 = arith.addf %3, %6 : vector<3x3xf32>
    %c0_6 = arith.constant 0 : index
    %c0_7 = arith.constant 0 : index
    %8 = vector.load %arg6[%c0_6, %c0_7] : memref<3x3xf32, #tpu.memory_space<vmem>>, vector<3x3xf32>
    tpu.vector_store %arg6[%c0_6, %c0_7], %7 {strides = array<i32>} : memref<3x3xf32, #tpu.memory_space<vmem>>, vector<3x3xf32>,
    return
  }
  func.func @transform_0(%arg0: i32, %arg1: i32, %arg2: i32) -> (i32, i32) {
    %c0_i32 = arith.constant 0 : i32
    return %arg0, %arg2 : i32, i32
  }
  func.func @transform_1(%arg0: i32, %arg1: i32, %arg2: i32) -> (i32, i32) {
    %c0_i32 = arith.constant 0 : i32
    return %arg2, %arg1 : i32, i32
  }
  func.func @transform_2(%arg0: i32, %arg1: i32, %arg2: i32) -> (i32, i32) {
    %c0_i32 = arith.constant 0 : i32
    return %arg0, %arg1 : i32, i32
  }
  func.func @transform_3(%arg0: i32, %arg1: i32, %arg2: i32) -> (i32, i32) {
    %c0_i32 = arith.constant 0 : i32
    return %arg0, %arg1 : i32, i32
  }
}

</mosaic_0001>

<bundles_post_ra>
// kernel: tpu_custom_call.1
= control target key start
LH: loop header
LB: loop body
LE: loop exit
PB: predicated region body
PF: predicated region fallthrough
CT: control target
= control target key end

     0   :  { %8 = vsyncpa [#allocation3], 0  ;;  %s298_s0 = inlined_call_operand.hbm [shape: f32[3,3], index: 0, kind: input, shape index: {}]   ;;  %s299_s1 = inlined_call_operand.hbm [shape: f32[3,3], index: 1, kind: input, shape index: {}]   ;;  %s300_s2 = inlined_call_operand.vmem [shape: f32[3,3], index: 2, kind: input, shape index: {}]   ;;  %s301_s3 = inlined_call_operand.hbm [shape: f32[3,3], index: 3, kind: output, shape index: {}]  }
   0x1   :  { %9 = vsyncpa [#allocation6], 0 }
   0x2   :  { %10 = vsyncpa [#allocation4], 0  ;;  %s232_s12 = smov [#allocation2]   ;;  %s233_s14 = smov [#allocation5]  }
   0x3   :  { %s17_s13 = sshll.u32 %s232_s12, 4  ;;  %s27_s15 = sshll.u32 %s233_s14, 4  ;;  %s18_s13 = int_to_ptr.vmem [resolvable:$true] %s17_s13  ;;  %s28_s15 = int_to_ptr.vmem [resolvable:$true] %s27_s15 }
   0x4   :  { %s160_s18 = scalar_lea.hbm %s298_s0, 64 }
   0x5   :  { %p161_p0 = scmp.ne.s32.totalorder %s298_s0, %s160_s18  ;;  %p164_p1 = scmp.lt.u32.totalorder %s160_s18, %s298_s0 }
   0x7   :  { %p166_p2 = pnand %p164_p1, %p161_p0 }
   0x9   :  { %169 = shalt.err (!%p166_p2)
}
   0xa   :  { %s170_s23 = scalar_lea.vmem %s18_s13, 64  ;;  %p175_p4 = scmp.lt.s32.totalorder %s18_s13, %s18_s13 }
   0xb   :  { %p171_p3 = scmp.ne.s32.totalorder %s18_s13, %s170_s23  ;;  %p176_p5 = scmp.lt.s32.totalorder %s170_s23, %s170_s23 }
   0xd   :  { %p177_p6 = por %p176_p5, %p175_p4 }
   0xf   :  { %p178_p7 = pnand %p177_p6, %p171_p3 }
  0x11   :  { %181 = shalt.err (!%p178_p7)
}
  0x12   :  { %20 = dma.hbm_to_vmem [thread:$0]  %s298_s0, 64, %s18_s13, [#allocation3]  }
  0x13   :  { %s182_s28 = scalar_lea.hbm %s299_s1, 64 }
  0x14   :  { %p183_p8 = scmp.ne.s32.totalorder %s299_s1, %s182_s28  ;;  %p186_p9 = scmp.lt.u32.totalorder %s182_s28, %s299_s1 }
  0x16   :  { %p188_p10 = pnand %p186_p9, %p183_p8 }
  0x18   :  { %191 = shalt.err (!%p188_p10)
}
  0x19   :  { %s192_s6 = scalar_lea.vmem %s28_s15, 64  ;;  %p197_p12 = scmp.lt.s32.totalorder %s28_s15, %s28_s15 }
  0x1a   :  { %p193_p11 = scmp.ne.s32.totalorder %s28_s15, %s192_s6  ;;  %p198_p13 = scmp.lt.s32.totalorder %s192_s6, %s192_s6 }
  0x1c   :  { %p199_p0 = por %p198_p13, %p197_p12 }
  0x1e   :  { %p200_p1 = pnand %p199_p0, %p193_p11 }
  0x20   :  { %203 = shalt.err (!%p200_p1)
}
  0x21   :  { %30 = dma.hbm_to_vmem [thread:$0]  %s299_s1, 64, %s28_s15, [#allocation6]  }
  0x22   :  { %226 = dma.done.wait [#allocation3], 64  }
  0x23   :  { %227 = vsyncadd [#allocation3], 4294967232 }
  0x24   :  { %228 = dma.done.wait [#allocation6], 64  }
  0x25   :  { %229 = vsyncadd [#allocation6], 4294967232  ;;  %v234_v0 = vmov 0.0   ;;  %vm235_vm0 = vmmov 0   ;;  %vm44_vm1 = vcmask 18432   ;;  %vm53_vm2 = vcmask 1042432  }
  0x26   :  { %150 = vmatprep.subr.mxu0 %v234_v0  ;;  %152 = vmatprep.mubr.msk.f32.mxu0 %vm235_vm0, %v234_v0  ;;  %vm49_vm3 = vcmask 23552   ;;  %v43_v1 = vld [vmem:[%s300_s2] sm:$0x7]  ;;  %v48_v2 = vld [vmem:[#allocation5] sm:$0x7]  ;;  %s236_s1 = smov [#allocation7]  }
  0x27   :  { %v47_v3 = vld [vmem:[#allocation2] sm:$0x7]  ;;  %45 = vst.msk [vmem:[#allocation7] sm:$0x7] %vm44_vm1, %v43_v1  ;;  %151 = vmatpush3.msk.msra.mxu0 %vm53_vm2, %v48_v2  ;;  %s136_s10 = sshll.u32 %s236_s1, 4  ;;  %s137_s10 = int_to_ptr.vmem [resolvable:$true] %s136_s10 }
  0x28   :  { %153 = vmatmul.mubr.msk.f32.vlgmr.msra.gmra.mrb[0].mxu0 %vm49_vm3, %v47_v3  ;;  %s204_s11 = scalar_lea.vmem %s137_s10, 64  ;;  %p209_p3 = scmp.lt.s32.totalorder %s137_s10, %s137_s10 }
  0x29   :  { %p205_p2 = scmp.ne.s32.totalorder %s137_s10, %s204_s11  ;;  %p210_p4 = scmp.lt.s32.totalorder %s204_s11, %s204_s11 }
  0x2b   :  { %p211_p5 = por %p210_p4, %p209_p3 }
  0x2d   :  { %p212_p6 = pnand %p211_p5, %p205_p2 }
  0x2e   :  { %v46_v4 = vld [vmem:[#allocation7] sm:$0x7] }
  0xfb   :  { %v123_v5 = vpop.f32.mrb[0].mxu0 }
  0xfc   :  { %v127_v6 = vadd.f32 %v123_v5, %v46_v4  ;;  %v154_v7 = vpop.f32.mrb[1].mxu0 }
  0xfe   :  { %129 = vst.msk [vmem:[#allocation7] sm:$0x7] %vm44_vm1, %v127_v6 }
  0xff   :  { %215 = shalt.err (!%p212_p6)
}
 0x100   :  { %s216_s13 = scalar_lea.hbm %s301_s3, 64 }
 0x101   :  { %p217_p7 = scmp.ne.s32.totalorder %s301_s3, %s216_s13  ;;  %p220_p8 = scmp.lt.u32.totalorder %s216_s13, %s301_s3 }
 0x103   :  { %p222_p9 = pnand %p220_p8, %p217_p7 }
 0x105   :  { %225 = shalt.err (!%p222_p9)
}
 0x106   :  { %139 = dma.vmem_to_hbm [thread:$0]  %s137_s10, 64, %s301_s3, [#allocation4]  }
 0x107   :  { %230 = dma.done.wait [#allocation4], 64  }
 0x108   :  { %231 = vsyncadd [#allocation4], 4294967232 }
 0x109   :  { %143 = vsyncpa [#allocation3], 1 }
 0x10a   :  { %144 = vsyncpa [#allocation6], 1 }
 0x10b   :  { %145 = vsyncpa [#allocation4], 1 }

</bundles_post_ra>
